<compile_context>
chip_gen: v6e
topology: v6e:2x2x1
jax: 0.10.0
libtpu: 0.0.40
codegen_flags: <defaults>
</compile_context>

<pallas_src>
import functools

import numpy as np

import jax
import jax.numpy as jnp
from jax.experimental import pallas as pl
from jax.experimental.pallas import tpu as pltpu


def _round_up(x, m):
    return (x + m - 1) // m * m


def _build_decomp_matrix(seq_len, kernel_sizes):
    """Static (L, L) matrix M such that moving_mean_rows = x_rows @ M.

    For every kernel size K it encodes:
      - the linear-ramp padding (a linear map of rows 0, 1, L-2, L-1 of x),
      - the AvgPool1d(K, stride=1) banded 1/K matrix,
      - the final average over the kernel sizes.
    Built in float64 numpy at trace time (tiny, compile-time constant).
    """
    L = seq_len
    M = np.zeros((L, L), np.float64)
    for K in kernel_sizes:
        K = int(K)
        pad = (K - 1) // 2
        Lp = L + 2 * pad
        # Padding matrix P: x_padded = x @ P,   P: (L, Lp)
        P = np.zeros((L, Lp), np.float64)
        P[np.arange(L), np.arange(L) + pad] = 1.0
        for j in range(pad):                     # front ramp, factors 1..pad
            w = (j + 1) / (pad + 1)
            P[0, j] = 1.0 - w
            P[1, j] = w
        for r in range(pad):                     # end ramp, factors 0..pad-1
            w = r / (pad + 1)
            P[L - 1, pad + L + r] = 1.0 - w
            P[L - 2, pad + L + r] = w
        # Pooling matrix A: mean = x_padded @ A,   A: (Lp, L)
        A = np.zeros((Lp, L), np.float64)
        for t in range(L):
            A[t:t + K, t] = 1.0 / K
        M += P @ A
    M /= len(kernel_sizes)
    return jnp.asarray(M, jnp.float32)


def _decomp_kernel(x_ref, m_ref, mean_ref, sea_ref, *, tile_n):
    # x_ref:    (TM, L)   rows = flattened (batch, channel), lanes = time
    # m_ref:    (L, TN)   static decomposition matrix (time-column tile)
    # mean_ref: (TM, TN)  averaged moving mean over all kernel sizes
    # sea_ref:  (TM, TN)  residual  (x - moving_mean)
    x = x_ref[...].astype(jnp.float32)                      # (TM, L)
    mean = jnp.dot(x, m_ref[...], preferred_element_type=jnp.float32)  # MXU
    mean_ref[...] = mean.astype(mean_ref.dtype)
    if tile_n == x_ref.shape[1]:
        x_cols = x
    else:
        j = pl.program_id(1)
        col = pl.multiple_of(j * tile_n, tile_n)
        x_cols = x_ref[:, pl.ds(col, tile_n)].astype(jnp.float32)
    sea_ref[...] = (x_cols - mean).astype(sea_ref.dtype)


def series_decomp_multi_forward(x, kernel_sizes):
    """Fused series_decomp_multi forward.  x: (B, L, C) -> (sea, moving_mean)."""
    b, l, c = x.shape
    kernel_sizes = tuple(int(k) for k in kernel_sizes)
    # Residual addition in the torch module requires equal output lengths,
    # which with stride=1 needs odd kernel sizes (pad = (K-1)//2).
    assert all(k % 2 == 1 for k in kernel_sizes), "kernel sizes must be odd"
    assert l >= 2 or max(kernel_sizes) == 1, "need seq_len >= 2 for ramp padding"

    dec_mat = _build_decomp_matrix(l, kernel_sizes)          # (L, L) float32

    # Lane-dense layout: time on the lane axis, (batch, channel) on sublanes.
    rows = b * c
    x_rows = x.transpose(0, 2, 1).reshape(rows, l)

    # Row tiling (sublane axis): multiple of 8, capped at 128 for VMEM and
    # to give enough parallel grid entries for megacore sharding.
    tile_m = min(128, _round_up(rows, 8))
    rows_p = _round_up(rows, tile_m)
    if rows_p != rows:
        x_rows = jnp.pad(x_rows, ((0, rows_p - rows), (0, 0)))

    # Time tiling (lane axis): largest 128-multiple divisor of L, else full L.
    tile_n = l
    for cand in (512, 384, 256, 128):
        if l % cand == 0:
            tile_n = cand
            break

    grid = (rows_p // tile_m, l // tile_n)
    kernel = functools.partial(_decomp_kernel, tile_n=tile_n)

    mean_rows, sea_rows = pl.pallas_call(
        kernel,
        out_shape=(
            jax.ShapeDtypeStruct((rows_p, l), x.dtype),
            jax.ShapeDtypeStruct((rows_p, l), x.dtype),
        ),
        grid=grid,
        in_specs=[
            pl.BlockSpec((tile_m, l), lambda i, j: (i, 0)),
            pl.BlockSpec((l, tile_n), lambda i, j: (0, j)),
        ],
        out_specs=(
            pl.BlockSpec((tile_m, tile_n), lambda i, j: (i, j)),
            pl.BlockSpec((tile_m, tile_n), lambda i, j: (i, j)),
        ),
        compiler_params=pltpu.CompilerParams(
            dimension_semantics=("parallel", "parallel"),
            vmem_limit_bytes=32 * 1024 * 1024,
        ),
    )(x_rows, dec_mat)

    def _back(rows2d):
        return rows2d[:rows].reshape(b, c, l).transpose(0, 2, 1)

    return _back(sea_rows), _back(mean_rows)


def series_decomp_multi_reference(x, kernel_sizes):
    """Pure-JAX reference mirroring the PyTorch forward exactly."""
    means, res = [], []
    for K in kernel_sizes:
        pad = (K - 1) // 2
        start = x[:, :1, :]
        end = x[:, -1:, :]
        start_diff = (x[:, 1:2, :] - start) / (pad + 1)
        end_diff = (end - x[:, -2:-1, :]) / (pad + 1)
        front = [start + start_diff * (i + 1) for i in range(pad)]
        back = [end - end_diff * (pad - i) for i in range(pad, 0, -1)]
        xp = jnp.concatenate(front + [x] + back, axis=1) if pad > 0 else x
        l_out = xp.shape[1] - K + 1
        windows = jnp.stack([xp[:, t:t + K, :] for t in range(l_out)], axis=1)
        mean = windows.mean(axis=2)                          # AvgPool1d(K, 1)
        means.append(mean)
        res.append(x - mean)
    sea = sum(res) / len(res)
    moving_mean = sum(means) / len(means)
    return sea, moving_mean


if __name__ == "__main__":
    kernel_sizes = (3, 7, 11)

    key = jax.random.PRNGKey(0)
    B, L, C = 2, 16, 8
    x = jax.random.normal(key, (B, L, C), dtype=jnp.float32)

    sea, mean = series_decomp_multi_forward(x, kernel_sizes)
    sea = jax.block_until_ready(sea)
    mean = jax.block_until_ready(mean)

    sea_ref, mean_ref = series_decomp_multi_reference(x, kernel_sizes)
    assert sea.shape == sea_ref.shape and mean.shape == mean_ref.shape
    assert jnp.allclose(mean, mean_ref, atol=1e-5, rtol=1e-5), "mean mismatch"
    assert jnp.allclose(sea, sea_ref, atol=1e-5, rtol=1e-5), "residual mismatch"

    print("KERNEL_OK")
</pallas_src>

<mosaic_0001>
module attributes {stable_mosaic.version = 11 : i64} {
  func.func @_decomp_kernel(%arg0: i32, %arg1: i32, %arg2: memref<16x16xf32, #tpu.memory_space<vmem>>, %arg3: memref<16x16xf32, #tpu.memory_space<vmem>>, %arg4: memref<16x16xf32, #tpu.memory_space<vmem>>, %arg5: memref<16x16xf32, #tpu.memory_space<vmem>>) attributes {dimension_semantics = [#tpu.dimension_semantics<parallel>, #tpu.dimension_semantics<parallel>], iteration_bounds = array<i64: 1, 1>, scalar_prefetch = 0 : i64, scratch_operands = 0 : i64, tpu.core_type = #tpu.core_type<tc>, window_params = [{transform_indices = @transform_0, window_bounds = array<i64: 16, 16>}, {transform_indices = @transform_1, window_bounds = array<i64: 16, 16>}, {transform_indices = @transform_2, window_bounds = array<i64: 16, 16>}, {transform_indices = @transform_3, window_bounds = array<i64: 16, 16>}]} {
    %c0 = arith.constant 0 : index
    %c0_0 = arith.constant 0 : index
    %0 = vector.load %arg2[%c0, %c0_0] : memref<16x16xf32, #tpu.memory_space<vmem>>, vector<16x16xf32>
    %c0_1 = arith.constant 0 : index
    %c0_2 = arith.constant 0 : index
    %1 = vector.load %arg3[%c0_1, %c0_2] : memref<16x16xf32, #tpu.memory_space<vmem>>, vector<16x16xf32>
    %cst = arith.constant dense<0.000000e+00> : vector<16x16xf32>
    %2 = tpu.matmul %0, %1, %cst {dimension_numbers = #tpu.dot_dimension_numbers<[1], [0], [0], [1], [0, 0, 1, 1], [], []>} : vector<16x16xf32>, vector<16x16xf32>, vector<16x16xf32> -> vector<16x16xf32>
    %c0_3 = arith.constant 0 : index
    %c0_4 = arith.constant 0 : index
    %3 = vector.load %arg4[%c0_3, %c0_4] : memref<16x16xf32, #tpu.memory_space<vmem>>, vector<16x16xf32>
    tpu.vector_store %arg4[%c0_3, %c0_4], %2 {strides = array<i32>} : memref<16x16xf32, #tpu.memory_space<vmem>>, vector<16x16xf32>,
    %4 = arith.subf %0, %2 : vector<16x16xf32>
    %c0_5 = arith.constant 0 : index
    %c0_6 = arith.constant 0 : index
    %5 = vector.load %arg5[%c0_5, %c0_6] : memref<16x16xf32, #tpu.memory_space<vmem>>, vector<16x16xf32>
    tpu.vector_store %arg5[%c0_5, %c0_6], %4 {strides = array<i32>} : memref<16x16xf32, #tpu.memory_space<vmem>>, vector<16x16xf32>,
    return
  }
  func.func @transform_0(%arg0: i32, %arg1: i32) -> (i32, i32) {
    %c0_i32 = arith.constant 0 : i32
    %c0_i32_0 = arith.constant 0 : i32
    return %arg0, %c0_i32 : i32, i32
  }
  func.func @transform_1(%arg0: i32, %arg1: i32) -> (i32, i32) {
    %c0_i32 = arith.constant 0 : i32
    %c0_i32_0 = arith.constant 0 : i32
    return %c0_i32, %arg1 : i32, i32
  }
  func.func @transform_2(%arg0: i32, %arg1: i32) -> (i32, i32) {
    %c0_i32 = arith.constant 0 : i32
    return %arg0, %arg1 : i32, i32
  }
  func.func @transform_3(%arg0: i32, %arg1: i32) -> (i32, i32) {
    %c0_i32 = arith.constant 0 : i32
    return %arg0, %arg1 : i32, i32
  }
}

</mosaic_0001>

<bundles_post_ra>
// kernel: tpu_custom_call.1
= control target key start
LH: loop header
LB: loop body
LE: loop exit
PB: predicated region body
PF: predicated region fallthrough
CT: control target
= control target key end

     0   :  { %9 = vsyncpa [#allocation3], 0  ;;  %s332_s0 = inlined_call_operand.hbm [shape: f32[16,16], index: 0, kind: input, shape index: {}]   ;;  %s333_s1 = inlined_call_operand.hbm [shape: f32[16,16], index: 1, kind: input, shape index: {}]   ;;  %s334_s2 = inlined_call_operand.hbm [shape: f32[16,16], index: 2, kind: output, shape index: {0}]   ;;  %s335_s3 = inlined_call_operand.hbm [shape: f32[16,16], index: 3, kind: output, shape index: {1}]  }
   0x1   :  { %10 = vsyncpa [#allocation6], 0 }
   0x2   :  { %11 = vsyncpa [#allocation4], 0 }
   0x3   :  { %12 = vsyncpa [#allocation9], 0  ;;  %s276_s12 = smov [#allocation2]  }
   0x4   :  { %s18_s13 = sshll.u32 %s276_s12, 4  ;;  %s19_s13 = int_to_ptr.vmem [resolvable:$true] %s18_s13 }
   0x5   :  { %s196_s14 = scalar_lea.vmem %s19_s13, 256  ;;  %p201_p1 = scmp.lt.s32.totalorder %s19_s13, %s19_s13 }
   0x6   :  { %p197_p0 = scmp.ne.s32.totalorder %s19_s13, %s196_s14  ;;  %p202_p2 = scmp.lt.s32.totalorder %s196_s14, %s196_s14 }
   0x8   :  { %p203_p3 = por %p202_p2, %p201_p1 }
   0xa   :  { %p204_p4 = pnand %p203_p3, %p197_p0 }
   0xc   :  { %207 = shalt.err (!%p204_p4)
}
   0xd   :  { %s277_s15 = smov 128   ;;  %s278_s16 = smov 8  }
   0xe   :  { %24 = dma.hbm_to_vmem [thread:$0]  %s332_s0, 256, %s19_s13, [#allocation3], %s277_s15, %s277_s15, %s278_s16  }
   0xf   :  { %s279_s19 = smov [#allocation5]  }
  0x10   :  { %s30_s20 = sshll.u32 %s279_s19, 4  ;;  %s31_s20 = int_to_ptr.vmem [resolvable:$true] %s30_s20 }
  0x11   :  { %s216_s21 = scalar_lea.vmem %s31_s20, 256  ;;  %p221_p6 = scmp.lt.s32.totalorder %s31_s20, %s31_s20 }
  0x12   :  { %p217_p5 = scmp.ne.s32.totalorder %s31_s20, %s216_s21  ;;  %p222_p7 = scmp.lt.s32.totalorder %s216_s21, %s216_s21 }
  0x14   :  { %p223_p8 = por %p222_p7, %p221_p6 }
  0x16   :  { %p224_p9 = pnand %p223_p8, %p217_p5 }
  0x18   :  { %227 = shalt.err (!%p224_p9)
}
  0x19   :  { %36 = dma.hbm_to_vmem [thread:$0]  %s333_s1, 256, %s31_s20, [#allocation6], %s277_s15, %s277_s15, %s278_s16  }
  0x1a   :  { %268 = dma.done.wait [#allocation3], 256  }
  0x1b   :  { %269 = vsyncadd [#allocation3], 4294967040 }
  0x1c   :  { %270 = dma.done.wait [#allocation6], 256  }
  0x1d   :  { %271 = vsyncadd [#allocation6], 4294967040  ;;  %vm47_vm0 = vcmask 130048   ;;  %v46_v0 = vld [vmem:[#allocation5 + $0x8] sm:$0xff]  ;;  %v45_v1 = vld [vmem:[#allocation5] sm:$0xff]  ;;  %s280_s0 = smov [#allocation7]  }
  0x1e   :  { %v43_v2 = vld [vmem:[#allocation2] sm:$0xff]  ;;  %175 = vmatprep.subr.mxu0 %v46_v0  ;;  %v44_v3 = vld [vmem:[#allocation2 + $0x8] sm:$0xff]  ;;  %s140_s24 = sshll.u32 %s280_s0, 4  ;;  %s281_s1 = smov [#allocation8]   ;;  %s141_s24 = int_to_ptr.vmem [resolvable:$true] %s140_s24 }
  0x1f   :  { %179 = vmatprep.mubr.msk.f32.mxu0 %vm47_vm0, %v43_v2  ;;  %176 = vmatpush3.msra.mxu0 %v46_v0  ;;  %s152_s25 = sshll.u32 %s281_s1, 4  ;;  %s228_s26 = scalar_lea.vmem %s141_s24, 256  ;;  %s153_s25 = int_to_ptr.vmem [resolvable:$true] %s152_s25 }
  0x20   :  { %177 = vmatprep.subr.mxu0 %v45_v1  ;;  %p229_p10 = scmp.ne.s32.totalorder %s141_s24, %s228_s26  ;;  %p233_p11 = scmp.lt.s32.totalorder %s141_s24, %s141_s24 }
  0x21   :  { %178 = vmatpush3.msra.mxu0 %v45_v1  ;;  %p234_p12 = scmp.lt.s32.totalorder %s228_s26, %s228_s26 }
  0x22   :  { %180 = vmatmul.mubr.msk.f32.vlgmr.msra.gmra.mxu0 %vm47_vm0, %v44_v3 }
  0x23   :  { %p235_p13 = por %p234_p12, %p233_p11 }
  0x25   :  { %p236_p0 = pnand %p235_p13, %p229_p10 }
  0xe2   :  { %v181_v4 = vpop.f32.mrf.mxu0 }
  0xe3   :  { %130 = vst.msk [vmem:[#allocation7 + $0x8] sm:$0xff] %vm47_vm0, %v181_v4  ;;  %v132_v5 = vsub.f32 %v44_v3, %v181_v4 }
  0xe4   :  { %v120_v6 = vpop.f32.mrf.mxu0 }
  0xe5   :  { %134 = vst.msk [vmem:[#allocation8 + $0x8] sm:$0xff] %vm47_vm0, %v132_v5  ;;  %129 = vst.msk [vmem:[#allocation7] sm:$0xff] %vm47_vm0, %v120_v6  ;;  %v131_v7 = vsub.f32 %v43_v2, %v120_v6 }
  0xe6   :  { %239 = shalt.err (!%p236_p0)
}
  0xe7   :  { %146 = dma.vmem_to_hbm [thread:$0]  %s141_s24, 256, %s334_s2, [#allocation4], %s277_s15, %s277_s15, %s278_s16   ;;  %133 = vst.msk [vmem:[#allocation8] sm:$0xff] %vm47_vm0, %v131_v7 }
  0xe8   :  { %s248_s29 = scalar_lea.vmem %s153_s25, 256  ;;  %p253_p2 = scmp.lt.s32.totalorder %s153_s25, %s153_s25 }
  0xe9   :  { %p249_p1 = scmp.ne.s32.totalorder %s153_s25, %s248_s29  ;;  %p254_p3 = scmp.lt.s32.totalorder %s248_s29, %s248_s29 }
  0xeb   :  { %p255_p4 = por %p254_p3, %p253_p2 }
  0xed   :  { %p256_p5 = pnand %p255_p4, %p249_p1 }
  0xef   :  { %259 = shalt.err (!%p256_p5)
}
  0xf0   :  { %158 = dma.vmem_to_hbm [thread:$0]  %s153_s25, 256, %s335_s3, [#allocation9], %s277_s15, %s277_s15, %s278_s16  }
  0xf1   :  { %272 = dma.done.wait [#allocation4], 256  }
  0xf2   :  { %273 = vsyncadd [#allocation4], 4294967040 }
  0xf3   :  { %274 = dma.done.wait [#allocation9], 256  }
  0xf4   :  { %275 = vsyncadd [#allocation9], 4294967040 }
  0xf5   :  { %165 = vsyncpa [#allocation3], 1 }
  0xf6   :  { %166 = vsyncpa [#allocation6], 1 }
  0xf7   :  { %167 = vsyncpa [#allocation4], 1 }
  0xf8   :  { %168 = vsyncpa [#allocation9], 1 }

</bundles_post_ra>
